<compile_context>
chip_gen: v7x
topology: tpu7x:2x2x1
jax: 0.10.0
libtpu: 0.0.40
codegen_flags: <defaults>
</compile_context>

<pallas_src>
import functools

import jax
import jax.numpy as jnp
import numpy as np
from jax.experimental import pallas as pl
from jax.experimental.pallas import tpu as pltpu

EPS = 1e-3
KSIZE = 3  # the reference module hard-codes the depthwise kernel to 3x3


# ----------------------------------------------------------------------------
# Small helpers
# ----------------------------------------------------------------------------

def _round_up(x, m):
    return ((x + m - 1) // m) * m


def _largest_divisor_leq(n, cap):
    for d in range(min(n, cap), 0, -1):
        if n % d == 0:
            return d
    return 1


def _vmem_limit_bytes():
    """Generation-aware scoped-VMEM budget (use the chip's capacity, keep headroom)."""
    try:
        cap = int(pltpu.get_tpu_info().vmem_capacity_bytes)
    except Exception:
        cap = 64 * 1024 * 1024
    return int(min(cap * 3 // 4, 100 * 1024 * 1024))


# ----------------------------------------------------------------------------
# Pallas kernel
# ----------------------------------------------------------------------------

def _sepconv_kernel(x_ref, w_ref, b_ref, o_ref, acc_ref, *, nb, ksize, ho, pregathered):
    """Fused depthwise 3x3 + 1x1 conv + BN + ReLU for NB images x one lane tile.

    x_ref: stride=1 : (NB, H, W*Cin)          bf16  input slab (lane dim = W*Cin)
           stride>1 : (NB, K, Ho, W*Cin)      bf16  pre-gathered tap rows (contiguous loads)
    w_ref: (K, W*Cin, LT)                     bf16  banded, BN-folded combined conv weights
    b_ref: (1, LT)                            f32   folded bias (dw+pw bias + BN shift), tiled
    o_ref: (NB, Ho, LT)                       bf16  lane-dense output tile (LT % 128 == 0)
    acc_ref: (Ho, LT)                         f32   VMEM scratch accumulator
    """
    # Hoisted bias broadcast: materialized once per invocation, reused by every image.
    bias = jnp.broadcast_to(b_ref[...], acc_ref.shape)
    for b in range(nb):                                   # static unroll over NB images
        for ki in range(ksize):                           # 3 taps = 3 row-shifted matmuls
            if pregathered:
                lhs = x_ref[b, ki]                        # contiguous (Ho, W*Cin) slice
            else:
                lhs = x_ref[b, ki:ki + ho, :]             # static row window (stride 1)
            part = jnp.dot(lhs, w_ref[ki],
                           preferred_element_type=jnp.float32)   # MXU, f32 accumulation
            if ki == 0:
                acc_ref[...] = part
            else:
                acc_ref[...] += part
        o_ref[b] = jnp.maximum(acc_ref[...] + bias, 0.0).astype(o_ref.dtype)


# ----------------------------------------------------------------------------
# Weight folding helpers (host-side, trace time)
# ----------------------------------------------------------------------------

def _banded_weights(w_eff, width, stride, n_pad):
    """Banded conv matrix with lane padding.

    w_eff: np.ndarray [K, K, Cin, Cout] (BN-folded dense conv weight).
    Returns np.ndarray [K, W*Cin, n_pad] such that
      y[ho, wo*Cout+co] = sum_ki  x_row(ho, ki) @ M[ki][:, wo*Cout+co]
    (columns >= Wo*Cout are zero padding for 128-lane alignment).
    """
    k, _, cin, cout = w_eff.shape
    wo = (width - k) // stride + 1
    m = np.zeros((k, width * cin, n_pad), np.float32)
    for ki in range(k):
        for kj in range(k):
            for w in range(wo):
                w_in = w * stride + kj
                m[ki, w_in * cin:(w_in + 1) * cin, w * cout:(w + 1) * cout] = w_eff[ki, kj]
    return m


def build_params(key, in_channels, out_channels, stride=1):
    """Synthetic deterministic parameters mirroring the torch module's state dict."""
    ks = jax.random.split(key, 8)
    wd = 0.3 * jax.random.normal(ks[0], (in_channels, KSIZE, KSIZE), jnp.float32)
    bd = 0.1 * jax.random.normal(ks[1], (in_channels,), jnp.float32)
    wp = 0.3 * jax.random.normal(ks[2], (out_channels, in_channels), jnp.float32)
    bp = 0.1 * jax.random.normal(ks[3], (out_channels,), jnp.float32)
    gamma = 1.0 + 0.1 * jax.random.normal(ks[4], (out_channels,), jnp.float32)
    beta = 0.1 * jax.random.normal(ks[5], (out_channels,), jnp.float32)
    mean = 0.1 * jax.random.normal(ks[6], (out_channels,), jnp.float32)
    var = 0.5 + jax.random.uniform(ks[7], (out_channels,), jnp.float32)

    # Fold BN (running stats, eps=1e-3) + both conv biases at build time.
    scale = gamma / jnp.sqrt(var + EPS)                               # [Cout]
    w_eff = jnp.einsum("cij,oc->ijco", wd, wp) * scale                # [K,K,Cin,Cout]
    b_eff = (wp @ bd + bp - mean) * scale + beta                      # [Cout]

    return {
        "stride": int(stride),
        "dw_w": wd, "dw_b": bd, "pw_w": wp, "pw_b": bp,
        "bn": (gamma, beta, mean, var),
        "w_eff": w_eff, "b_eff": b_eff,
    }


# ----------------------------------------------------------------------------
# NHWC / bf16 fast path (use this between layers; no layout round trips)
# ----------------------------------------------------------------------------

def separable_conv2d_nhwc(x_nhwc, params, *, images_per_block=None, lane_tile=None):
    stride = params["stride"]
    n, h, w, cin = x_nhwc.shape
    ho = (h - KSIZE) // stride + 1
    wo = (w - KSIZE) // stride + 1
    cout = params["pw_w"].shape[0]

    # ---- tiling decisions -------------------------------------------------
    if images_per_block is None:
        images_per_block = _largest_divisor_leq(n, 8)     # amortize per-step overhead
    lanes_min = _round_up(wo * cout, 128)                 # 128-aligned -> unmasked stores
    if lane_tile is None:
        # Keep each resident weight block ~<= 4 MiB (v7x VMEM headroom even at big widths).
        cap = max(128, (4 * 1024 * 1024 // (KSIZE * w * cin * 2)) // 128 * 128)
        lane_tile = min(lanes_min, 2048, cap)
    lanes_pad = _round_up(lanes_min, lane_tile)
    n_img_blocks = n // images_per_block
    n_lane_tiles = lanes_pad // lane_tile

    # ---- BN/bias folding + banding (host numpy at trace time; baked constant) ----
    w_eff = np.asarray(params["w_eff"], np.float32)                   # [K,K,Cin,Cout]
    w_band = jnp.asarray(_banded_weights(w_eff, w, stride, lanes_pad)).astype(jnp.bfloat16)
    b_eff = np.asarray(params["b_eff"], np.float32)
    b_pad = np.zeros((1, lanes_pad), np.float32)
    b_pad[0, :wo * cout] = np.tile(b_eff, wo)
    b_pad = jnp.asarray(b_pad)

    # ---- input slab: bf16 lane-dense [N, H, W*Cin] -------------------------
    x = x_nhwc.astype(jnp.bfloat16).reshape(n, h, w * cin)
    if stride == 1:
        x_in, pregathered = x, False
        x_spec = pl.BlockSpec((images_per_block, h, w * cin), lambda ib, j: (ib, 0, 0))
    else:
        # Pre-gather tap rows in the wrapper so in-kernel loads stay contiguous
        # (avoids strided sublane slices / XLU gathers).
        rows = [jax.lax.slice_in_dim(x, ki, ki + (ho - 1) * stride + 1,
                                     stride=stride, axis=1)
                for ki in range(KSIZE)]
        x_in, pregathered = jnp.stack(rows, axis=1), True              # (N, K, Ho, W*Cin)
        x_spec = pl.BlockSpec((images_per_block, KSIZE, ho, w * cin),
                              lambda ib, j: (ib, 0, 0, 0))

    kernel = functools.partial(_sepconv_kernel, nb=images_per_block, ksize=KSIZE,
                               ho=ho, pregathered=pregathered)
    flops = 2 * n * KSIZE * ho * (w * cin) * lanes_pad
    bytes_accessed = (int(x_in.size) * 2 + int(w_band.size) * 2
                      + int(b_pad.size) * 4 + n * ho * lanes_pad * 2)

    y = pl.pallas_call(
        kernel,
        out_shape=jax.ShapeDtypeStruct((n, ho, lanes_pad), jnp.bfloat16),
        grid_spec=pltpu.PrefetchScalarGridSpec(
            num_scalar_prefetch=0,
            grid=(n_img_blocks, n_lane_tiles),            # images x output-lane tiles
            in_specs=[
                x_spec,                                   # constant over j -> not re-DMA'd
                pl.BlockSpec((KSIZE, w * cin, lane_tile), lambda ib, j: (0, 0, j)),
                pl.BlockSpec((1, lane_tile), lambda ib, j: (0, j)),
            ],
            out_specs=pl.BlockSpec((images_per_block, ho, lane_tile),
                                   lambda ib, j: (ib, 0, j)),
            scratch_shapes=[pltpu.VMEM((ho, lane_tile), jnp.float32)],
        ),
        compiler_params=pltpu.CompilerParams(
            dimension_semantics=("parallel", "parallel"),  # pipelined + megacore-shardable
            vmem_limit_bytes=_vmem_limit_bytes(),
        ),
        cost_estimate=pl.CostEstimate(flops=flops, transcendentals=0,
                                      bytes_accessed=bytes_accessed),
    )(x_in, w_band, b_pad)

    # Drop the lane padding and un-flatten; stays bf16 NHWC for the next layer.
    return y[:, :, :wo * cout].reshape(n, ho, wo, cout)


# ----------------------------------------------------------------------------
# Model-boundary wrapper (NCHW in / NCHW out, matching the PyTorch module)
# ----------------------------------------------------------------------------

def separable_conv2d(x_nchw, params, **kwargs):
    # Layout/dtype conversion happens only at the model boundary; chains of these
    # blocks should call separable_conv2d_nhwc directly and stay bf16/NHWC.
    x_nhwc = jnp.transpose(x_nchw, (0, 2, 3, 1))
    y = separable_conv2d_nhwc(x_nhwc, params, **kwargs)
    return jnp.transpose(y, (0, 3, 1, 2)).astype(jnp.float32)


# ----------------------------------------------------------------------------
# Pure-JAX f32 reference (same semantics as the torch module, inference BN)
# ----------------------------------------------------------------------------

def separable_conv2d_ref(x_nchw, params):
    s = params["stride"]
    wd, bd = params["dw_w"], params["dw_b"]
    wp, bp = params["pw_w"], params["pw_b"]
    gamma, beta, mean, var = params["bn"]
    cin = wd.shape[0]
    dw = jax.lax.conv_general_dilated(
        x_nchw.astype(jnp.float32), wd[:, None, :, :],
        window_strides=(s, s), padding="VALID",
        dimension_numbers=("NCHW", "OIHW", "NCHW"),
        feature_group_count=cin)
    dw = dw + bd[None, :, None, None]
    pw = jnp.einsum("nchw,oc->nohw", dw, wp) + bp[None, :, None, None]
    y = (pw - mean[None, :, None, None]) * (
        gamma[None, :, None, None] / jnp.sqrt(var[None, :, None, None] + EPS))
    y = y + beta[None, :, None, None]
    return jnp.maximum(y, 0.0)


# ----------------------------------------------------------------------------
# Demo
# ----------------------------------------------------------------------------

if __name__ == "__main__":
    key = jax.random.PRNGKey(0)
    kx, kp1, kp2 = jax.random.split(key, 3)

    N, Cin, H, W = 2, 4, 16, 16
    Cout = 32
    x = jax.random.normal(kx, (N, Cin, H, W), jnp.float32)

    # --- stride=1 (module default) -----------------------------------------
    p1 = build_params(kp1, Cin, Cout, stride=1)
    fwd1 = jax.jit(functools.partial(separable_conv2d, params=p1))
    out1 = jax.block_until_ready(fwd1(x))
    Ho1, Wo1 = H - KSIZE + 1, W - KSIZE + 1
    assert out1.shape == (N, Cout, Ho1, Wo1), out1.shape
    assert bool(jnp.all(jnp.isfinite(out1)))
    err1 = float(jnp.max(jnp.abs(out1 - separable_conv2d_ref(x, p1))))
    assert err1 < 1e-1, f"stride=1 max abs error vs f32 reference: {err1}"

    # --- stride=2 (pre-gathered tap path, previously untested) --------------
    p2 = build_params(kp2, Cin, Cout, stride=2)
    fwd2 = jax.jit(functools.partial(separable_conv2d, params=p2))
    out2 = jax.block_until_ready(fwd2(x))
    Ho2 = (H - KSIZE) // 2 + 1
    Wo2 = (W - KSIZE) // 2 + 1
    assert out2.shape == (N, Cout, Ho2, Wo2), out2.shape
    assert bool(jnp.all(jnp.isfinite(out2)))
    err2 = float(jnp.max(jnp.abs(out2 - separable_conv2d_ref(x, p2))))
    assert err2 < 1e-1, f"stride=2 max abs error vs f32 reference: {err2}"

    print("KERNEL_OK")
</pallas_src>

<mosaic_0001>
module attributes {stable_mosaic.version = 11 : i64} {
  func.func @_sepconv_kernel(%arg0: i32, %arg1: i32, %arg2: memref<2x16x64xbf16, #tpu.memory_space<vmem>>, %arg3: memref<3x64x512xbf16, #tpu.memory_space<vmem>>, %arg4: memref<1x512xf32, #tpu.memory_space<vmem>>, %arg5: memref<2x14x512xbf16, #tpu.memory_space<vmem>>, %arg6: memref<14x512xf32, #tpu.memory_space<vmem>>) attributes {dimension_semantics = [#tpu.dimension_semantics<parallel>, #tpu.dimension_semantics<parallel>], iteration_bounds = array<i64: 1, 1>, scalar_prefetch = 0 : i64, scratch_operands = 1 : i64, tpu.core_type = #tpu.core_type<tc>, window_params = [{transform_indices = @transform_0, window_bounds = array<i64: 2, 16, 64>}, {transform_indices = @transform_1, window_bounds = array<i64: 3, 64, 512>}, {transform_indices = @transform_2, window_bounds = array<i64: 1, 512>}, {transform_indices = @transform_3, window_bounds = array<i64: 2, 14, 512>}]} {
    %c0 = arith.constant 0 : index
    %c0_0 = arith.constant 0 : index
    %0 = vector.load %arg4[%c0, %c0_0] : memref<1x512xf32, #tpu.memory_space<vmem>>, vector<1x512xf32>
    %1 = vector.shape_cast %0 : vector<1x512xf32> to vector<1x512xf32>
    %2 = vector.broadcast %1 : vector<1x512xf32> to vector<14x512xf32>
    %c0_1 = arith.constant 0 : index
    %c0_2 = arith.constant 0 : index
    %c0_3 = arith.constant 0 : index
    %3 = vector.load %arg2[%c0_1, %c0_2, %c0_3] : memref<2x16x64xbf16, #tpu.memory_space<vmem>>, vector<1x14x64xbf16>
    %4 = vector.shape_cast %3 : vector<1x14x64xbf16> to vector<14x64xbf16>
    %c0_4 = arith.constant 0 : index
    %c0_5 = arith.constant 0 : index
    %c0_6 = arith.constant 0 : index
    %5 = vector.load %arg3[%c0_4, %c0_5, %c0_6] : memref<3x64x512xbf16, #tpu.memory_space<vmem>>, vector<1x64x512xbf16>
    %6 = vector.shape_cast %5 : vector<1x64x512xbf16> to vector<64x512xbf16>
    %cst = arith.constant dense<0.000000e+00> : vector<14x512xf32>
    %7 = tpu.matmul %4, %6, %cst {dimension_numbers = #tpu.dot_dimension_numbers<[1], [0], [0], [1], [0, 0, 1, 1], [], []>} : vector<14x64xbf16>, vector<64x512xbf16>, vector<14x512xf32> -> vector<14x512xf32>
    %c0_7 = arith.constant 0 : index
    %c0_8 = arith.constant 0 : index
    %8 = vector.load %arg6[%c0_7, %c0_8] : memref<14x512xf32, #tpu.memory_space<vmem>>, vector<14x512xf32>
    tpu.vector_store %arg6[%c0_7, %c0_8], %7 {strides = array<i32>} : memref<14x512xf32, #tpu.memory_space<vmem>>, vector<14x512xf32>,
    %c0_9 = arith.constant 0 : index
    %c1 = arith.constant 1 : index
    %c0_10 = arith.constant 0 : index
    %9 = vector.load %arg2[%c0_9, %c1, %c0_10] : memref<2x16x64xbf16, #tpu.memory_space<vmem>>, vector<1x14x64xbf16>
    %10 = vector.shape_cast %9 : vector<1x14x64xbf16> to vector<14x64xbf16>
    %c1_11 = arith.constant 1 : index
    %c0_12 = arith.constant 0 : index
    %c0_13 = arith.constant 0 : index
    %11 = vector.load %arg3[%c1_11, %c0_12, %c0_13] : memref<3x64x512xbf16, #tpu.memory_space<vmem>>, vector<1x64x512xbf16>
    %12 = vector.shape_cast %11 : vector<1x64x512xbf16> to vector<64x512xbf16>
    %cst_14 = arith.constant dense<0.000000e+00> : vector<14x512xf32>
    %13 = tpu.matmul %10, %12, %cst_14 {dimension_numbers = #tpu.dot_dimension_numbers<[1], [0], [0], [1], [0, 0, 1, 1], [], []>} : vector<14x64xbf16>, vector<64x512xbf16>, vector<14x512xf32> -> vector<14x512xf32>
    %c0_15 = arith.constant 0 : index
    %c0_16 = arith.constant 0 : index
    %14 = vector.load %arg6[%c0_15, %c0_16] : memref<14x512xf32, #tpu.memory_space<vmem>>, vector<14x512xf32>
    %15 = arith.addf %14, %13 : vector<14x512xf32>
    %c0_17 = arith.constant 0 : index
    %c0_18 = arith.constant 0 : index
    %16 = vector.load %arg6[%c0_17, %c0_18] : memref<14x512xf32, #tpu.memory_space<vmem>>, vector<14x512xf32>
    tpu.vector_store %arg6[%c0_17, %c0_18], %15 {strides = array<i32>} : memref<14x512xf32, #tpu.memory_space<vmem>>, vector<14x512xf32>,
    %c0_19 = arith.constant 0 : index
    %c2 = arith.constant 2 : index
    %c0_20 = arith.constant 0 : index
    %17 = vector.load %arg2[%c0_19, %c2, %c0_20] : memref<2x16x64xbf16, #tpu.memory_space<vmem>>, vector<1x14x64xbf16>
    %18 = vector.shape_cast %17 : vector<1x14x64xbf16> to vector<14x64xbf16>
    %c2_21 = arith.constant 2 : index
    %c0_22 = arith.constant 0 : index
    %c0_23 = arith.constant 0 : index
    %19 = vector.load %arg3[%c2_21, %c0_22, %c0_23] : memref<3x64x512xbf16, #tpu.memory_space<vmem>>, vector<1x64x512xbf16>
    %20 = vector.shape_cast %19 : vector<1x64x512xbf16> to vector<64x512xbf16>
    %cst_24 = arith.constant dense<0.000000e+00> : vector<14x512xf32>
    %21 = tpu.matmul %18, %20, %cst_24 {dimension_numbers = #tpu.dot_dimension_numbers<[1], [0], [0], [1], [0, 0, 1, 1], [], []>} : vector<14x64xbf16>, vector<64x512xbf16>, vector<14x512xf32> -> vector<14x512xf32>
    %c0_25 = arith.constant 0 : index
    %c0_26 = arith.constant 0 : index
    %22 = vector.load %arg6[%c0_25, %c0_26] : memref<14x512xf32, #tpu.memory_space<vmem>>, vector<14x512xf32>
    %23 = arith.addf %22, %21 : vector<14x512xf32>
    %c0_27 = arith.constant 0 : index
    %c0_28 = arith.constant 0 : index
    %24 = vector.load %arg6[%c0_27, %c0_28] : memref<14x512xf32, #tpu.memory_space<vmem>>, vector<14x512xf32>
    tpu.vector_store %arg6[%c0_27, %c0_28], %23 {strides = array<i32>} : memref<14x512xf32, #tpu.memory_space<vmem>>, vector<14x512xf32>,
    %c0_29 = arith.constant 0 : index
    %c0_30 = arith.constant 0 : index
    %25 = vector.load %arg6[%c0_29, %c0_30] : memref<14x512xf32, #tpu.memory_space<vmem>>, vector<14x512xf32>
    %26 = arith.addf %25, %2 : vector<14x512xf32>
    %cst_31 = arith.constant 0.000000e+00 : f32
    %27 = vector.broadcast %cst_31 : f32 to vector<14x512xf32>
    %28 = arith.maximumf %26, %27 : vector<14x512xf32>
    %29 = arith.truncf %28 : vector<14x512xf32> to vector<14x512xbf16>
    %c0_32 = arith.constant 0 : index
    %c0_33 = arith.constant 0 : index
    %c0_34 = arith.constant 0 : index
    %30 = vector.load %arg5[%c0_32, %c0_33, %c0_34] : memref<2x14x512xbf16, #tpu.memory_space<vmem>>, vector<1x14x512xbf16>
    %31 = vector.shape_cast %30 : vector<1x14x512xbf16> to vector<14x512xbf16>
    %32 = vector.shape_cast %29 : vector<14x512xbf16> to vector<1x14x512xbf16>
    tpu.vector_store %arg5[%c0_32, %c0_33, %c0_34], %32 {strides = array<i32>} : memref<2x14x512xbf16, #tpu.memory_space<vmem>>, vector<1x14x512xbf16>,
    %c1_35 = arith.constant 1 : index
    %c0_36 = arith.constant 0 : index
    %c0_37 = arith.constant 0 : index
    %33 = vector.load %arg2[%c1_35, %c0_36, %c0_37] : memref<2x16x64xbf16, #tpu.memory_space<vmem>>, vector<1x14x64xbf16>
    %34 = vector.shape_cast %33 : vector<1x14x64xbf16> to vector<14x64xbf16>
    %c0_38 = arith.constant 0 : index
    %c0_39 = arith.constant 0 : index
    %c0_40 = arith.constant 0 : index
    %35 = vector.load %arg3[%c0_38, %c0_39, %c0_40] : memref<3x64x512xbf16, #tpu.memory_space<vmem>>, vector<1x64x512xbf16>
    %36 = vector.shape_cast %35 : vector<1x64x512xbf16> to vector<64x512xbf16>
    %cst_41 = arith.constant dense<0.000000e+00> : vector<14x512xf32>
    %37 = tpu.matmul %34, %36, %cst_41 {dimension_numbers = #tpu.dot_dimension_numbers<[1], [0], [0], [1], [0, 0, 1, 1], [], []>} : vector<14x64xbf16>, vector<64x512xbf16>, vector<14x512xf32> -> vector<14x512xf32>
    %c0_42 = arith.constant 0 : index
    %c0_43 = arith.constant 0 : index
    %38 = vector.load %arg6[%c0_42, %c0_43] : memref<14x512xf32, #tpu.memory_space<vmem>>, vector<14x512xf32>
    tpu.vector_store %arg6[%c0_42, %c0_43], %37 {strides = array<i32>} : memref<14x512xf32, #tpu.memory_space<vmem>>, vector<14x512xf32>,
    %c1_44 = arith.constant 1 : index
    %c1_45 = arith.constant 1 : index
    %c0_46 = arith.constant 0 : index
    %39 = vector.load %arg2[%c1_44, %c1_45, %c0_46] : memref<2x16x64xbf16, #tpu.memory_space<vmem>>, vector<1x14x64xbf16>
    %40 = vector.shape_cast %39 : vector<1x14x64xbf16> to vector<14x64xbf16>
    %c1_47 = arith.constant 1 : index
    %c0_48 = arith.constant 0 : index
    %c0_49 = arith.constant 0 : index
    %41 = vector.load %arg3[%c1_47, %c0_48, %c0_49] : memref<3x64x512xbf16, #tpu.memory_space<vmem>>, vector<1x64x512xbf16>
    %42 = vector.shape_cast %41 : vector<1x64x512xbf16> to vector<64x512xbf16>
    %cst_50 = arith.constant dense<0.000000e+00> : vector<14x512xf32>
    %43 = tpu.matmul %40, %42, %cst_50 {dimension_numbers = #tpu.dot_dimension_numbers<[1], [0], [0], [1], [0, 0, 1, 1], [], []>} : vector<14x64xbf16>, vector<64x512xbf16>, vector<14x512xf32> -> vector<14x512xf32>
    %c0_51 = arith.constant 0 : index
    %c0_52 = arith.constant 0 : index
    %44 = vector.load %arg6[%c0_51, %c0_52] : memref<14x512xf32, #tpu.memory_space<vmem>>, vector<14x512xf32>
    %45 = arith.addf %44, %43 : vector<14x512xf32>
    %c0_53 = arith.constant 0 : index
    %c0_54 = arith.constant 0 : index
    %46 = vector.load %arg6[%c0_53, %c0_54] : memref<14x512xf32, #tpu.memory_space<vmem>>, vector<14x512xf32>
    tpu.vector_store %arg6[%c0_53, %c0_54], %45 {strides = array<i32>} : memref<14x512xf32, #tpu.memory_space<vmem>>, vector<14x512xf32>,
    %c1_55 = arith.constant 1 : index
    %c2_56 = arith.constant 2 : index
    %c0_57 = arith.constant 0 : index
    %47 = vector.load %arg2[%c1_55, %c2_56, %c0_57] : memref<2x16x64xbf16, #tpu.memory_space<vmem>>, vector<1x14x64xbf16>
    %48 = vector.shape_cast %47 : vector<1x14x64xbf16> to vector<14x64xbf16>
    %c2_58 = arith.constant 2 : index
    %c0_59 = arith.constant 0 : index
    %c0_60 = arith.constant 0 : index
    %49 = vector.load %arg3[%c2_58, %c0_59, %c0_60] : memref<3x64x512xbf16, #tpu.memory_space<vmem>>, vector<1x64x512xbf16>
    %50 = vector.shape_cast %49 : vector<1x64x512xbf16> to vector<64x512xbf16>
    %cst_61 = arith.constant dense<0.000000e+00> : vector<14x512xf32>
    %51 = tpu.matmul %48, %50, %cst_61 {dimension_numbers = #tpu.dot_dimension_numbers<[1], [0], [0], [1], [0, 0, 1, 1], [], []>} : vector<14x64xbf16>, vector<64x512xbf16>, vector<14x512xf32> -> vector<14x512xf32>
    %c0_62 = arith.constant 0 : index
    %c0_63 = arith.constant 0 : index
    %52 = vector.load %arg6[%c0_62, %c0_63] : memref<14x512xf32, #tpu.memory_space<vmem>>, vector<14x512xf32>
    %53 = arith.addf %52, %51 : vector<14x512xf32>
    %c0_64 = arith.constant 0 : index
    %c0_65 = arith.constant 0 : index
    %54 = vector.load %arg6[%c0_64, %c0_65] : memref<14x512xf32, #tpu.memory_space<vmem>>, vector<14x512xf32>
    tpu.vector_store %arg6[%c0_64, %c0_65], %53 {strides = array<i32>} : memref<14x512xf32, #tpu.memory_space<vmem>>, vector<14x512xf32>,
    %c0_66 = arith.constant 0 : index
    %c0_67 = arith.constant 0 : index
    %55 = vector.load %arg6[%c0_66, %c0_67] : memref<14x512xf32, #tpu.memory_space<vmem>>, vector<14x512xf32>
    %56 = arith.addf %55, %2 : vector<14x512xf32>
    %cst_68 = arith.constant 0.000000e+00 : f32
    %57 = vector.broadcast %cst_68 : f32 to vector<14x512xf32>
    %58 = arith.maximumf %56, %57 : vector<14x512xf32>
    %59 = arith.truncf %58 : vector<14x512xf32> to vector<14x512xbf16>
    %c1_69 = arith.constant 1 : index
    %c0_70 = arith.constant 0 : index
    %c0_71 = arith.constant 0 : index
    %60 = vector.load %arg5[%c1_69, %c0_70, %c0_71] : memref<2x14x512xbf16, #tpu.memory_space<vmem>>, vector<1x14x512xbf16>
    %61 = vector.shape_cast %60 : vector<1x14x512xbf16> to vector<14x512xbf16>
    %62 = vector.shape_cast %59 : vector<14x512xbf16> to vector<1x14x512xbf16>
    tpu.vector_store %arg5[%c1_69, %c0_70, %c0_71], %62 {strides = array<i32>} : memref<2x14x512xbf16, #tpu.memory_space<vmem>>, vector<1x14x512xbf16>,
    return
  }
  func.func @transform_0(%arg0: i32, %arg1: i32) -> (i32, i32, i32) {
    %c0_i32 = arith.constant 0 : i32
    %c0_i32_0 = arith.constant 0 : i32
    %c0_i32_1 = arith.constant 0 : i32
    return %arg0, %c0_i32, %c0_i32_0 : i32, i32, i32
  }
  func.func @transform_1(%arg0: i32, %arg1: i32) -> (i32, i32, i32) {
    %c0_i32 = arith.constant 0 : i32
    %c0_i32_0 = arith.constant 0 : i32
    %c0_i32_1 = arith.constant 0 : i32
    return %c0_i32, %c0_i32_0, %arg1 : i32, i32, i32
  }
  func.func @transform_2(%arg0: i32, %arg1: i32) -> (i32, i32) {
    %c0_i32 = arith.constant 0 : i32
    %c0_i32_0 = arith.constant 0 : i32
    return %c0_i32, %arg1 : i32, i32
  }
  func.func @transform_3(%arg0: i32, %arg1: i32) -> (i32, i32, i32) {
    %c0_i32 = arith.constant 0 : i32
    %c0_i32_0 = arith.constant 0 : i32
    return %arg0, %c0_i32, %arg1 : i32, i32, i32
  }
}

</mosaic_0001>

<bundles_post_ra>
// kernel: separable_conv2d.1
= control target key start
LH: loop header
LB: loop body
LE: loop exit
PB: predicated region body
PF: predicated region fallthrough
CT: control target
= control target key end

     0   :  { %v1713_v1 = vmov 0   ;;  %vm140_vm0 = vcmask 523264   ;;  %s2163_s1 = inlined_call_operand.vmem [shape: bf16[3,64,512], index: 1, kind: input, shape index: {}]   ;;  %s2164_s0 = inlined_call_operand.vmem [shape: bf16[2,16,64], index: 0, kind: input, shape index: {}]   ;;  %s2165_s2 = inlined_call_operand.vmem [shape: f32[1,512], index: 2, kind: input, shape index: {}]   ;;  %s2166_s3 = inlined_call_operand.vmem [shape: bf16[2,14,512], index: 3, kind: output, shape index: {}]  }
   0x1   :  { %v1737_v0 = vld [vmem:[%s2163_s1 + $0x4] ss:$16 sps:$4 sm:$0xff]   ;;  %176 = vmatprep.mubr.bf16.mxu0 %v1713_v1  ;;  %219 = vmatprep.mubr.bf16.mxu1 %v1713_v1  ;;  %v1744_v2 = vld [vmem:[%s2163_s1 + $0xc] ss:$16 sps:$4 sm:$0xff]   ;;  %v1750_v3 = vld [vmem:[%s2163_s1] ss:$16 sps:$4 sm:$0xff]  }
   0x2   :  { %144 = vmatprep.subr.bf16.mxu0 %v1737_v0  ;;  %v1755_v4 = vld [vmem:[%s2163_s1 + $0x8] ss:$16 sps:$4 sm:$0xff]   ;;  %187 = vmatprep.subr.bf16.mxu1 %v1744_v2  ;;  %v1761_v5 = vld [vmem:[%s2163_s1 + $0x24] ss:$16 sps:$4 sm:$0xff]   ;;  %v1768_v6 = vld [vmem:[%s2163_s1 + $0x2c] ss:$16 sps:$4 sm:$0xff]  }
   0x3   :  { %145 = vmatpush1.bf16.msra.mxu0 %v1750_v3  ;;  %188 = vmatpush1.bf16.msra.mxu1 %v1755_v4  ;;  %v1773_v7 = vld [vmem:[%s2163_s1 + $0x20] ss:$16 sps:$4 sm:$0xff]   ;;  %v1779_v8 = vld [vmem:[%s2163_s1 + $0x28] ss:$16 sps:$4 sm:$0xff]   ;;  %v1785_v9 = vld [vmem:[%s2163_s1 + $0x44] ss:$16 sps:$4 sm:$0xff]  }
   0x4   :  { %146 = vmatprep.subr.bf16.mxu0 %v1761_v5  ;;  %189 = vmatprep.subr.bf16.mxu1 %v1768_v6  ;;  %v1790_v10 = vld [vmem:[%s2163_s1 + $0x4c] ss:$16 sps:$4 sm:$0xff]   ;;  %v1795_v11 = vld [vmem:[%s2163_s1 + $0x40] ss:$16 sps:$4 sm:$0xff]   ;;  %v1800_v12 = vld [vmem:[%s2163_s1 + $0x48] ss:$16 sps:$4 sm:$0xff]  }
   0x5   :  { %v1807_v13 = vld [vmem:[%s2163_s1 + $0x64] ss:$16 sps:$4 sm:$0xff]   ;;  %v1814_v14 = vld [vmem:[%s2163_s1 + $0x6c] ss:$16 sps:$4 sm:$0xff]   ;;  %v1821_v15 = vld [vmem:[%s2163_s1 + $0x60] ss:$16 sps:$4 sm:$0xff]  }
   0x6   :  { %v1826_v16 = vld [vmem:[%s2163_s1 + $0x68] ss:$16 sps:$4 sm:$0xff]   ;;  %v1833_v17 = vld [vmem:[%s2163_s1 + $0x84] ss:$16 sps:$4 sm:$0xff]   ;;  %v1838_v18 = vld [vmem:[%s2163_s1 + $0x8c] ss:$16 sps:$4 sm:$0xff]  }
   0x7   :  { %147 = vmatpush1.bf16.msra.mxu0 %v1773_v7  ;;  %190 = vmatpush1.bf16.msra.mxu1 %v1779_v8  ;;  %v1659_v19 = vld [vmem:[%s2164_s0] sm:$0x7f]   ;;  %v1853_v21 = vld [vmem:[%s2163_s1 + $0x88] ss:$16 sps:$4 sm:$0xff]   ;;  %v1865_v23 = vld [vmem:[%s2163_s1 + $0xac] ss:$16 sps:$4 sm:$0xff]  }
   0x8   :  { %148 = vmatprep.subr.bf16.mxu0 %v1785_v9  ;;  %191 = vmatprep.subr.bf16.mxu1 %v1790_v10  ;;  %v1846_v20 = vld [vmem:[%s2163_s1 + $0x80] ss:$16 sps:$4 sm:$0xff]   ;;  %v1858_v22 = vld [vmem:[%s2163_s1 + $0xa4] ss:$16 sps:$4 sm:$0xff]   ;;  %v1879_v25 = vld [vmem:[%s2163_s1 + $0xa8] ss:$16 sps:$4 sm:$0xff]  }
   0x9   :  { %v1872_v24 = vld [vmem:[%s2163_s1 + $0xa0] ss:$16 sps:$4 sm:$0xff]   ;;  %v1884_v26 = vld [vmem:[%s2163_s1 + $0xc4] ss:$16 sps:$4 sm:$0xff]   ;;  %v1891_v27 = vld [vmem:[%s2163_s1 + $0xcc] ss:$16 sps:$4 sm:$0xff]  }
   0xa   :  { %v1896_v28 = vld [vmem:[%s2163_s1 + $0xc0] ss:$16 sps:$4 sm:$0xff]   ;;  %v1908_v30 = vld [vmem:[%s2163_s1 + $0xc8] ss:$16 sps:$4 sm:$0xff]   ;;  %v1913_v31 = vld [vmem:[%s2163_s1 + $0xe4] ss:$16 sps:$4 sm:$0xff]  }
   0xb   :  { %149 = vmatpush1.bf16.msra.mxu0 %v1795_v11  ;;  %192 = vmatpush1.bf16.msra.mxu1 %v1800_v12  ;;  %v1684_v29 = vld [vmem:[%s2164_s0] sm:$0xff]   ;;  %v1920_v32 = vld [vmem:[%s2163_s1 + $0xec] ss:$16 sps:$4 sm:$0xff]   ;;  %v1932_v37 = vld [vmem:[%s2163_s1 + $0xe8] ss:$16 sps:$4 sm:$0xff]  }
   0xc   :  { %150 = vmatprep.subr.bf16.mxu0 %v1807_v13  ;;  %193 = vmatprep.subr.bf16.mxu1 %v1814_v14  ;;  %v265_v33 = vshll.u32 %v1684_v29, 16  ;;  %v263_v34 = vshrl.u32 %v1684_v29, 16  ;;  %v1927_v36 = vld [vmem:[%s2163_s1 + $0xe0] ss:$16 sps:$4 sm:$0xff]   ;;  %v1939_v38 = vld [vmem:[%s2163_s1 + $0x104] ss:$16 sps:$4 sm:$0xff]  }
   0xd   :  { %v1944_v39 = vld [vmem:[%s2163_s1 + $0x10c] ss:$16 sps:$4 sm:$0xff]   ;;  %v1951_v41 = vld [vmem:[%s2163_s1 + $0x100] ss:$16 sps:$4 sm:$0xff]   ;;  %v1956_v42 = vld [vmem:[%s2163_s1 + $0x108] ss:$16 sps:$4 sm:$0xff]  }
   0xe   :  { %v267_v35 = vrot.slane %v265_v33, 1  ;;  %v1963_v43 = vld [vmem:[%s2163_s1 + $0x124] ss:$16 sps:$4 sm:$0xff]   ;;  %v1968_v44 = vld [vmem:[%s2163_s1 + $0x12c] ss:$16 sps:$4 sm:$0xff]  }
   0xf   :  { %151 = vmatpush1.bf16.msra.mxu0 %v1821_v15  ;;  %194 = vmatpush1.bf16.msra.mxu1 %v1826_v16  ;;  %v1973_v45 = vld [vmem:[%s2163_s1 + $0x120] ss:$16 sps:$4 sm:$0xff]   ;;  %v1980_v46 = vld [vmem:[%s2163_s1 + $0x128] ss:$16 sps:$4 sm:$0xff]   ;;  %v1987_v47 = vld [vmem:[%s2163_s1 + $0x144] ss:$16 sps:$4 sm:$0xff]  }
  0x10   :  { %352 = vmatprep.subr.bf16.mxu0 %v1833_v17  ;;  %395 = vmatprep.subr.bf16.mxu1 %v1838_v18  ;;  %v268_v40 = vor.u32 %v267_v35, %v263_v34  ;;  %v1994_v48 = vld [vmem:[%s2163_s1 + $0x14c] ss:$16 sps:$4 sm:$0xff]   ;;  %v2003_v49 = vld [vmem:[%s2163_s1 + $0x140] ss:$16 sps:$4 sm:$0xff]   ;;  %v2008_v50 = vld [vmem:[%s2163_s1 + $0x148] ss:$16 sps:$4 sm:$0xff]  }
  0x11   :  { %v2015_v51 = vld [vmem:[%s2163_s1 + $0x164] ss:$16 sps:$4 sm:$0xff]   ;;  %v2020_v52 = vld [vmem:[%s2163_s1 + $0x16c] ss:$16 sps:$4 sm:$0xff]   ;;  %v2030_v54 = vld [vmem:[%s2163_s1 + $0x160] ss:$16 sps:$4 sm:$0xff]  }
  0x12   :  { %1447 = vmatmul.mubr.msk.bf16.vlgmr.msra.gmra.mrb[0].mxu0 %vm140_vm0, %v1659_v19  ;;  %1448 = vmatmul.mubr.msk.bf16.vlgmr.msra.gmra.mrb[0].mxu1 %vm140_vm0, %v1659_v19  ;;  %v1709_v53 = vld [vmem:[%s2164_s0] sm:$0xfe]   ;;  %v2035_v55 = vld [vmem:[%s2163_s1 + $0x168] ss:$16 sps:$4 sm:$0xff]  }
  0x13   :  { %353 = vmatpush1.bf16.msra.mxu0 %v1846_v20  ;;  %396 = vmatpush1.bf16.msra.mxu1 %v1853_v21  ;;  %v486_v56 = vrot.slane %v1709_v53, 1  ;;  %v1710_v57 = vld [vmem:[%s2164_s0 + $0x8] sm:$0x7f]   ;;  %v15_v33 = vld [vmem:[%s2165_s2] sm:$0xf] }
  0x14   :  { %354 = vmatprep.subr.bf16.mxu0 %v1858_v22  ;;  %397 = vmatprep.subr.bf16.mxu1 %v1865_v23  ;;  %v1711_v58 = vld [vmem:[%s2164_s0 + $0x8] sm:$0xff]  }
  0x15   :  { %384 = vmatprep.mubr.bf16.mxu0 %v1713_v1  ;;  %427 = vmatprep.mubr.bf16.mxu1 %v1713_v1  ;;  %v959_v59 = vshll.u32 %v1711_v58, 16  ;;  %v957_v60 = vshrl.u32 %v1711_v58, 16  ;;  %v1712_v63 = vld [vmem:[%s2164_s0 + $0x8] sm:$0xfe]  }
  0x17   :  { %355 = vmatpush1.bf16.msra.mxu0 %v1872_v24  ;;  %398 = vmatpush1.bf16.msra.mxu1 %v1879_v25  ;;  %v961_v61 = vrot.slane %v959_v59, 1 }
  0x18   :  { %356 = vmatprep.subr.bf16.mxu0 %v1884_v26  ;;  %399 = vmatprep.subr.bf16.mxu1 %v1891_v27 }
  0x19   :  { %v962_v62 = vor.u32 %v961_v61, %v957_v60 }
  0x1b   :  { %357 = vmatpush1.bf16.msra.mxu0 %v1896_v28  ;;  %400 = vmatpush1.bf16.msra.mxu1 %v1908_v30 }
  0x1c   :  { %358 = vmatprep.subr.bf16.mxu0 %v1913_v31  ;;  %401 = vmatprep.subr.bf16.mxu1 %v1920_v32 }
  0x1f   :  { %359 = vmatpush1.bf16.msra.mxu0 %v1927_v36  ;;  %402 = vmatpush1.bf16.msra.mxu1 %v1932_v37 }
  0x20   :  { %570 = vmatprep.subr.bf16.mxu0 %v1939_v38  ;;  %613 = vmatprep.subr.bf16.mxu1 %v1944_v39 }
  0x22   :  { %1482 = vmatmul.mubr.msk.bf16.vlgmr.msra.gmra.mrb[4].mxu0 %vm140_vm0, %v268_v40  ;;  %1483 = vmatmul.mubr.msk.bf16.vlgmr.msra.gmra.mrb[4].mxu1 %vm140_vm0, %v268_v40 }
  0x23   :  { %571 = vmatpush1.bf16.msra.mxu0 %v1951_v41  ;;  %614 = vmatpush1.bf16.msra.mxu1 %v1956_v42 }
  0x24   :  { %572 = vmatprep.subr.bf16.mxu0 %v1963_v43  ;;  %615 = vmatprep.subr.bf16.mxu1 %v1968_v44 }
  0x25   :  { %602 = vmatprep.mubr.bf16.mxu0 %v1713_v1  ;;  %645 = vmatprep.mubr.bf16.mxu1 %v1713_v1 }
  0x27   :  { %573 = vmatpush1.bf16.msra.mxu0 %v1973_v45  ;;  %616 = vmatpush1.bf16.msra.mxu1 %v1980_v46 }
  0x28   :  { %574 = vmatprep.subr.bf16.mxu0 %v1987_v47  ;;  %617 = vmatprep.subr.bf16.mxu1 %v1994_v48 }
  0x2b   :  { %575 = vmatpush1.bf16.msra.mxu0 %v2003_v49  ;;  %618 = vmatpush1.bf16.msra.mxu1 %v2008_v50 }
  0x2c   :  { %576 = vmatprep.subr.bf16.mxu0 %v2015_v51  ;;  %619 = vmatprep.subr.bf16.mxu1 %v2020_v52 }
  0x2f   :  { %577 = vmatpush1.bf16.msra.mxu0 %v2030_v54  ;;  %620 = vmatpush1.bf16.msra.mxu1 %v2035_v55 }
  0x30   :  { %839 = vmatprep.subr.bf16.mxu0 %v1737_v0  ;;  %882 = vmatprep.subr.bf16.mxu1 %v1744_v2  ;;  %v1179_v0 = vrot.slane %v1712_v63, 1 }
  0x32   :  { %1517 = vmatmul.mubr.msk.bf16.vlgmr.msra.gmra.mrb[8].mxu0 %vm140_vm0, %v486_v56  ;;  %1518 = vmatmul.mubr.msk.bf16.vlgmr.msra.gmra.mrb[8].mxu1 %vm140_vm0, %v486_v56 }
  0x33   :  { %840 = vmatpush1.bf16.msra.mxu0 %v1750_v3  ;;  %883 = vmatpush1.bf16.msra.mxu1 %v1755_v4 }
  0x34   :  { %841 = vmatprep.subr.bf16.mxu0 %v1761_v5  ;;  %884 = vmatprep.subr.bf16.mxu1 %v1768_v6 }
  0x35   :  { %871 = vmatprep.mubr.bf16.mxu0 %v1713_v1  ;;  %914 = vmatprep.mubr.bf16.mxu1 %v1713_v1 }
  0x37   :  { %842 = vmatpush1.bf16.msra.mxu0 %v1773_v7  ;;  %885 = vmatpush1.bf16.msra.mxu1 %v1779_v8 }
  0x38   :  { %843 = vmatprep.subr.bf16.mxu0 %v1785_v9  ;;  %886 = vmatprep.subr.bf16.mxu1 %v1790_v10 }
  0x3b   :  { %844 = vmatpush1.bf16.msra.mxu0 %v1795_v11  ;;  %887 = vmatpush1.bf16.msra.mxu1 %v1800_v12 }
  0x3c   :  { %845 = vmatprep.subr.bf16.mxu0 %v1807_v13  ;;  %888 = vmatprep.subr.bf16.mxu1 %v1814_v14 }
  0x3f   :  { %846 = vmatpush1.bf16.msra.mxu0 %v1821_v15  ;;  %889 = vmatpush1.bf16.msra.mxu1 %v1826_v16 }
  0x40   :  { %1046 = vmatprep.subr.bf16.mxu0 %v1833_v17  ;;  %1089 = vmatprep.subr.bf16.mxu1 %v1838_v18 }
  0x42   :  { %1542 = vmatmul.mubr.msk.bf16.vlgmr.msra.gmra.mrb[12].mxu0 %vm140_vm0, %v1710_v57  ;;  %1543 = vmatmul.mubr.msk.bf16.vlgmr.msra.gmra.mrb[12].mxu1 %vm140_vm0, %v1710_v57 }
  0x43   :  { %1047 = vmatpush1.bf16.msra.mxu0 %v1846_v20  ;;  %1090 = vmatpush1.bf16.msra.mxu1 %v1853_v21 }
  0x44   :  { %1048 = vmatprep.subr.bf16.mxu0 %v1858_v22  ;;  %1091 = vmatprep.subr.bf16.mxu1 %v1865_v23 }
  0x45   :  { %1078 = vmatprep.mubr.bf16.mxu0 %v1713_v1  ;;  %1121 = vmatprep.mubr.bf16.mxu1 %v1713_v1 }
  0x47   :  { %1049 = vmatpush1.bf16.msra.mxu0 %v1872_v24  ;;  %1092 = vmatpush1.bf16.msra.mxu1 %v1879_v25 }
  0x48   :  { %1050 = vmatprep.subr.bf16.mxu0 %v1884_v26  ;;  %1093 = vmatprep.subr.bf16.mxu1 %v1891_v27  ;;  %v17_v27 = vlaneseq }
  0x4b   :  { %1051 = vmatpush1.bf16.msra.mxu0 %v1896_v28  ;;  %1094 = vmatpush1.bf16.msra.mxu1 %v1908_v30  ;;  %v18_v30 = vshrl.u32 %v17_v27, 7 }
  0x4c   :  { %1052 = vmatprep.subr.bf16.mxu0 %v1913_v31  ;;  %1095 = vmatprep.subr.bf16.mxu1 %v1920_v32 }
  0x4d   :  { %v19_v31 = vsub.s32 0, %v18_v30  ;;  %v27_v32 = vsub.s32 2, %v18_v30  ;;  %v23_v34 = vsub.s32 1, %v18_v30  ;;  %v31_v35 = vsub.s32 3, %v18_v30 }
  0x4f   :  { %1053 = vmatpush1.bf16.msra.mxu0 %v1927_v36  ;;  %1096 = vmatpush1.bf16.msra.mxu1 %v1932_v37  ;;  %v2115_v36 = vrot.slane %v15_v33, %v19_v31  ;;  %v2117_v37 = vrot.slane %v15_v33, %v27_v32  ;;  %v2119_v40 = vrot.slane %v15_v33, %v23_v34 }
  0x50   :  { %1263 = vmatprep.subr.bf16.mxu0 %v1939_v38  ;;  %1306 = vmatprep.subr.bf16.mxu1 %v1944_v39 }
  0x52   :  { %1579 = vmatmul.mubr.msk.bf16.vlgmr.msra.gmra.mrb[16].mxu0 %vm140_vm0, %v962_v62  ;;  %1580 = vmatmul.mubr.msk.bf16.vlgmr.msra.gmra.mrb[16].mxu1 %vm140_vm0, %v962_v62 }
  0x53   :  { %1264 = vmatpush1.bf16.msra.mxu0 %v1951_v41  ;;  %1307 = vmatpush1.bf16.msra.mxu1 %v1956_v42  ;;  %v2121_v41 = vrot.slane %v15_v33, %v31_v35 }
  0x54   :  { %1265 = vmatprep.subr.bf16.mxu0 %v1963_v43  ;;  %1308 = vmatprep.subr.bf16.mxu1 %v1968_v44 }
  0x55   :  { %1295 = vmatprep.mubr.bf16.mxu0 %v1713_v1  ;;  %1338 = vmatprep.mubr.bf16.mxu1 %v1713_v1 }
  0x57   :  { %1266 = vmatpush1.bf16.msra.mxu0 %v1973_v45  ;;  %1309 = vmatpush1.bf16.msra.mxu1 %v1980_v46 }
  0x58   :  { %1267 = vmatprep.subr.bf16.mxu0 %v1987_v47  ;;  %1310 = vmatprep.subr.bf16.mxu1 %v1994_v48 }
  0x5b   :  { %1268 = vmatpush1.bf16.msra.mxu0 %v2003_v49  ;;  %1311 = vmatpush1.bf16.msra.mxu1 %v2008_v50 }
  0x5c   :  { %1269 = vmatprep.subr.bf16.mxu0 %v2015_v51  ;;  %1312 = vmatprep.subr.bf16.mxu1 %v2020_v52 }
  0x5f   :  { %1270 = vmatpush1.bf16.msra.mxu0 %v2030_v54  ;;  %1313 = vmatpush1.bf16.msra.mxu1 %v2035_v55 }
  0x62   :  { %1616 = vmatmul.mubr.msk.bf16.vlgmr.msra.gmra.mrb[20].mxu0 %vm140_vm0, %v1179_v0  ;;  %1617 = vmatmul.mubr.msk.bf16.vlgmr.msra.gmra.mrb[20].mxu1 %vm140_vm0, %v1179_v0 }
  0xe5   :  { %v178_v1 = vpop.f32.mrb[0].mxu0  ;;  %v221_v2 = vpop.f32.mrb[0].mxu1 }
  0xe6   :  { %v180_v3 = vpop.f32.mrb[1].mxu0  ;;  %v223_v4 = vpop.f32.mrb[1].mxu1 }
  0xe7   :  { %v182_v5 = vpop.f32.mrb[2].mxu0  ;;  %v225_v6 = vpop.f32.mrb[2].mxu1 }
  0xe8   :  { %234 = vst [vmem:[#allocation2 + $0x20] sm:$0x3f] %v182_v5  ;;  %236 = vst [vmem:[#allocation2 + $0x30] sm:$0x3f] %v225_v6  ;;  %v184_v7 = vpop.f32.mrb[3].mxu0  ;;  %v227_v8 = vpop.f32.mrb[3].mxu1 }
  0xe9   :  { %235 = vst [vmem:[#allocation2 + $0x28] sm:$0x3f] %v184_v7  ;;  %237 = vst [vmem:[#allocation2 + $0x38] sm:$0x3f] %v227_v8 }
  0xef   :  { %v442_v18 = vld [vmem:[#allocation2 + $0x20] sm:$0x3f]  ;;  %v444_v20 = vld [vmem:[#allocation2 + $0x30] sm:$0x3f] }
  0xf0   :  { %v443_v24 = vld [vmem:[#allocation2 + $0x28] sm:$0x3f]  ;;  %v445_v26 = vld [vmem:[#allocation2 + $0x38] sm:$0x3f] }
  0xf5   :  { %v386_v9 = vpop.f32.mrb[4].mxu0  ;;  %v429_v10 = vpop.f32.mrb[4].mxu1 }
  0xf6   :  { %v446_v11 = vadd.f32 %v386_v9, %v178_v1  ;;  %v448_v12 = vadd.f32 %v429_v10, %v221_v2  ;;  %v388_v13 = vpop.f32.mrb[5].mxu0  ;;  %v431_v14 = vpop.f32.mrb[5].mxu1 }
  0xf7   :  { %v447_v15 = vadd.f32 %v388_v13, %v180_v3  ;;  %v449_v16 = vadd.f32 %v431_v14, %v223_v4  ;;  %v390_v17 = vpop.f32.mrb[6].mxu0  ;;  %v433_v19 = vpop.f32.mrb[6].mxu1 }
  0xf8   :  { %v450_v21 = vadd.f32 %v442_v18, %v390_v17  ;;  %v452_v22 = vadd.f32 %v444_v20, %v433_v19  ;;  %v392_v23 = vpop.f32.mrb[7].mxu0  ;;  %v435_v25 = vpop.f32.mrb[7].mxu1 }
  0xf9   :  { %v451_v28 = vadd.f32 %v443_v24, %v392_v23  ;;  %v453_v29 = vadd.f32 %v445_v26, %v435_v25 }
  0xfa   :  { %458 = vst [vmem:[#allocation2 + $0x20] sm:$0x3f] %v450_v21  ;;  %460 = vst [vmem:[#allocation2 + $0x30] sm:$0x3f] %v452_v22 }
  0xfb   :  { %459 = vst [vmem:[#allocation2 + $0x28] sm:$0x3f] %v451_v28  ;;  %461 = vst [vmem:[#allocation2 + $0x38] sm:$0x3f] %v453_v29 }
 0x101   :  { %v660_v49 = vld [vmem:[#allocation2 + $0x20] sm:$0x3f]  ;;  %v662_v51 = vld [vmem:[#allocation2 + $0x30] sm:$0x3f] }
 0x102   :  { %v661_v55 = vld [vmem:[#allocation2 + $0x28] sm:$0x3f]  ;;  %v663_v57 = vld [vmem:[#allocation2 + $0x38] sm:$0x3f] }
 0x105   :  { %v604_v38 = vpop.f32.mrb[8].mxu0  ;;  %v647_v39 = vpop.f32.mrb[8].mxu1 }
 0x106   :  { %v664_v42 = vadd.f32 %v604_v38, %v446_v11  ;;  %v666_v43 = vadd.f32 %v647_v39, %v448_v12  ;;  %v606_v44 = vpop.f32.mrb[9].mxu0  ;;  %v649_v45 = vpop.f32.mrb[9].mxu1 }
 0x107   :  { %v665_v46 = vadd.f32 %v606_v44, %v447_v15  ;;  %v667_v47 = vadd.f32 %v649_v45, %v449_v16  ;;  %v608_v48 = vpop.f32.mrb[10].mxu0  ;;  %v651_v50 = vpop.f32.mrb[10].mxu1 }
 0x108   :  { %v668_v52 = vadd.f32 %v660_v49, %v608_v48  ;;  %v670_v53 = vadd.f32 %v662_v51, %v651_v50  ;;  %v610_v54 = vpop.f32.mrb[11].mxu0  ;;  %v653_v56 = vpop.f32.mrb[11].mxu1  ;;  %v688_v58 = vadd.f32 %v664_v42, %v2115_v36  ;;  %v690_v59 = vadd.f32 %v666_v43, %v2117_v37 }
 0x109   :  { %v669_v60 = vadd.f32 %v661_v55, %v610_v54  ;;  %v671_v61 = vadd.f32 %v663_v57, %v653_v56  ;;  %v689_v62 = vadd.f32 %v665_v46, %v2119_v40  ;;  %v691_v63 = vadd.f32 %v667_v47, %v2121_v41 }
 0x10a   :  { %676 = vst [vmem:[#allocation2 + $0x20] sm:$0x3f] %v668_v52  ;;  %678 = vst [vmem:[#allocation2 + $0x30] sm:$0x3f] %v670_v53  ;;  %v696_v0 = vmax.f32 %v688_v58, 0.0  ;;  %v698_v1 = vmax.f32 %v690_v59, 0.0 }
 0x10b   :  { %677 = vst [vmem:[#allocation2 + $0x28] sm:$0x3f] %v669_v60  ;;  %679 = vst [vmem:[#allocation2 + $0x38] sm:$0x3f] %v671_v61  ;;  %v697_v2 = vmax.f32 %v689_v62, 0.0  ;;  %v699_v3 = vmax.f32 %v691_v63, 0.0 }
 0x10d   :  { %v1626_v4 = vpack.c.bf16 %v697_v2, %v696_v0  ;;  %v1627_v5 = vpack.c.bf16 %v699_v3, %v698_v1 }
 0x10f   :  { %728 = vst [vmem:[%s2166_s3] sm:$0xff] %v1626_v4  ;;  %729 = vst [vmem:[%s2166_s3 + $0x8] sm:$0xff] %v1627_v5 }
 0x111   :  { %v684_v6 = vld [vmem:[#allocation2 + $0x20] sm:$0x3f]  ;;  %v686_v7 = vld [vmem:[#allocation2 + $0x30] sm:$0x3f] }
 0x112   :  { %v692_v8 = vadd.f32 %v684_v6, %v2115_v36  ;;  %v694_v9 = vadd.f32 %v686_v7, %v2117_v37  ;;  %v685_v10 = vld [vmem:[#allocation2 + $0x28] sm:$0x3f]  ;;  %v687_v11 = vld [vmem:[#allocation2 + $0x38] sm:$0x3f] }
 0x113   :  { %v693_v12 = vadd.f32 %v685_v10, %v2119_v40  ;;  %v695_v13 = vadd.f32 %v687_v11, %v2121_v41 }
 0x114   :  { %v700_v14 = vmax.f32 %v692_v8, 0.0  ;;  %v702_v15 = vmax.f32 %v694_v9, 0.0 }
 0x115   :  { %v873_v16 = vpop.f32.mrb[12].mxu0  ;;  %v916_v17 = vpop.f32.mrb[12].mxu1  ;;  %v701_v18 = vmax.f32 %v693_v12, 0.0  ;;  %v703_v19 = vmax.f32 %v695_v13, 0.0 }
 0x116   :  { %v875_v20 = vpop.f32.mrb[13].mxu0  ;;  %v918_v21 = vpop.f32.mrb[13].mxu1 }
 0x117   :  { %v877_v22 = vpop.f32.mrb[14].mxu0  ;;  %v920_v23 = vpop.f32.mrb[14].mxu1  ;;  %v1628_v24 = vpack.c.bf16 %v701_v18, %v700_v14  ;;  %v1629_v25 = vpack.c.bf16 %v703_v19, %v702_v15 }
 0x118   :  { %929 = vst [vmem:[#allocation2 + $0x20] sm:$0x3f] %v877_v22  ;;  %931 = vst [vmem:[#allocation2 + $0x30] sm:$0x3f] %v920_v23  ;;  %v879_v26 = vpop.f32.mrb[15].mxu0  ;;  %v922_v27 = vpop.f32.mrb[15].mxu1 }
 0x119   :  { %730 = vst [vmem:[%s2166_s3 + $0x10] sm:$0x77] %v1628_v24  ;;  %930 = vst [vmem:[#allocation2 + $0x28] sm:$0x3f] %v879_v26 }
 0x11a   :  { %731 = vst [vmem:[%s2166_s3 + $0x18] sm:$0x77] %v1629_v25  ;;  %932 = vst [vmem:[#allocation2 + $0x38] sm:$0x3f] %v922_v27 }
 0x11f   :  { %v1136_v39 = vld [vmem:[#allocation2 + $0x20] sm:$0x3f]  ;;  %v1138_v43 = vld [vmem:[#allocation2 + $0x30] sm:$0x3f] }
 0x120   :  { %v1137_v47 = vld [vmem:[#allocation2 + $0x28] sm:$0x3f] }
 0x121   :  { %v1139_v49 = vld [vmem:[#allocation2 + $0x38] sm:$0x3f] }
 0x125   :  { %v1080_v28 = vpop.f32.mrb[16].mxu0  ;;  %v1123_v29 = vpop.f32.mrb[16].mxu1 }
 0x126   :  { %v1140_v30 = vadd.f32 %v1080_v28, %v873_v16  ;;  %v1142_v31 = vadd.f32 %v1123_v29, %v916_v17  ;;  %v1082_v32 = vpop.f32.mrb[17].mxu0  ;;  %v1125_v33 = vpop.f32.mrb[17].mxu1 }
 0x127   :  { %v1141_v34 = vadd.f32 %v1082_v32, %v875_v20  ;;  %v1143_v35 = vadd.f32 %v1125_v33, %v918_v21  ;;  %v1084_v38 = vpop.f32.mrb[18].mxu0  ;;  %v1127_v42 = vpop.f32.mrb[18].mxu1 }
 0x128   :  { %v1144_v44 = vadd.f32 %v1136_v39, %v1084_v38  ;;  %v1146_v45 = vadd.f32 %v1138_v43, %v1127_v42  ;;  %v1086_v46 = vpop.f32.mrb[19].mxu0  ;;  %v1129_v48 = vpop.f32.mrb[19].mxu1 }
 0x129   :  { %v1145_v50 = vadd.f32 %v1137_v47, %v1086_v46  ;;  %v1147_v51 = vadd.f32 %v1139_v49, %v1129_v48 }
 0x12a   :  { %1152 = vst [vmem:[#allocation2 + $0x20] sm:$0x3f] %v1144_v44  ;;  %1154 = vst [vmem:[#allocation2 + $0x30] sm:$0x3f] %v1146_v45 }
 0x12b   :  { %1153 = vst [vmem:[#allocation2 + $0x28] sm:$0x3f] %v1145_v50  ;;  %1155 = vst [vmem:[#allocation2 + $0x38] sm:$0x3f] %v1147_v51 }
 0x131   :  { %v1353_v61 = vld [vmem:[#allocation2 + $0x20] sm:$0x3f]  ;;  %v1355_v63 = vld [vmem:[#allocation2 + $0x30] sm:$0x3f] }
 0x132   :  { %v1354_v5 = vld [vmem:[#allocation2 + $0x28] sm:$0x3f]  ;;  %v1356_v7 = vld [vmem:[#allocation2 + $0x38] sm:$0x3f] }
 0x135   :  { %v1297_v52 = vpop.f32.mrb[20].mxu0  ;;  %v1340_v53 = vpop.f32.mrb[20].mxu1 }
 0x136   :  { %v1357_v54 = vadd.f32 %v1297_v52, %v1140_v30  ;;  %v1359_v55 = vadd.f32 %v1340_v53, %v1142_v31  ;;  %v1299_v56 = vpop.f32.mrb[21].mxu0  ;;  %v1342_v57 = vpop.f32.mrb[21].mxu1 }
 0x137   :  { %v1358_v58 = vadd.f32 %v1299_v56, %v1141_v34  ;;  %v1360_v59 = vadd.f32 %v1342_v57, %v1143_v35  ;;  %v1301_v60 = vpop.f32.mrb[22].mxu0  ;;  %v1344_v62 = vpop.f32.mrb[22].mxu1 }
 0x138   :  { %v1381_v0 = vadd.f32 %v1357_v54, %v2115_v36  ;;  %v1383_v1 = vadd.f32 %v1359_v55, %v2117_v37  ;;  %v1361_v2 = vadd.f32 %v1353_v61, %v1301_v60  ;;  %v1363_v3 = vadd.f32 %v1355_v63, %v1344_v62  ;;  %v1303_v4 = vpop.f32.mrb[23].mxu0  ;;  %v1346_v6 = vpop.f32.mrb[23].mxu1 }
 0x139   :  { %v1382_v8 = vadd.f32 %v1358_v58, %v2119_v40  ;;  %v1384_v9 = vadd.f32 %v1360_v59, %v2121_v41  ;;  %v1362_v10 = vadd.f32 %v1354_v5, %v1303_v4  ;;  %v1364_v11 = vadd.f32 %v1356_v7, %v1346_v6 }
 0x13a   :  { %v1389_v12 = vmax.f32 %v1381_v0, 0.0  ;;  %v1391_v13 = vmax.f32 %v1383_v1, 0.0  ;;  %1369 = vst [vmem:[#allocation2 + $0x20] sm:$0x3f] %v1361_v2  ;;  %1371 = vst [vmem:[#allocation2 + $0x30] sm:$0x3f] %v1363_v3 }
 0x13b   :  { %v1390_v14 = vmax.f32 %v1382_v8, 0.0  ;;  %v1392_v15 = vmax.f32 %v1384_v9, 0.0  ;;  %1370 = vst [vmem:[#allocation2 + $0x28] sm:$0x3f] %v1362_v10  ;;  %1372 = vst [vmem:[#allocation2 + $0x38] sm:$0x3f] %v1364_v11 }
 0x13d   :  { %v1630_v16 = vpack.c.bf16 %v1390_v14, %v1389_v12  ;;  %v1631_v17 = vpack.c.bf16 %v1392_v15, %v1391_v13 }
 0x13f   :  { %1622 = vst [vmem:[%s2166_s3 + $0x20] sm:$0xff] %v1630_v16  ;;  %1623 = vst [vmem:[%s2166_s3 + $0x28] sm:$0xff] %v1631_v17 }
 0x141   :  { %v1377_v18 = vld [vmem:[#allocation2 + $0x20] sm:$0x3f]  ;;  %v1379_v19 = vld [vmem:[#allocation2 + $0x30] sm:$0x3f] }
 0x142   :  { %v1385_v20 = vadd.f32 %v1377_v18, %v2115_v36  ;;  %v1387_v21 = vadd.f32 %v1379_v19, %v2117_v37  ;;  %v1378_v22 = vld [vmem:[#allocation2 + $0x28] sm:$0x3f]  ;;  %v1380_v23 = vld [vmem:[#allocation2 + $0x38] sm:$0x3f] }
 0x143   :  { %v1386_v24 = vadd.f32 %v1378_v22, %v2119_v40  ;;  %v1388_v25 = vadd.f32 %v1380_v23, %v2121_v41 }
 0x144   :  { %v1393_v26 = vmax.f32 %v1385_v20, 0.0  ;;  %v1395_v27 = vmax.f32 %v1387_v21, 0.0 }
 0x145   :  { %v1394_v28 = vmax.f32 %v1386_v24, 0.0  ;;  %v1396_v29 = vmax.f32 %v1388_v25, 0.0 }
 0x147   :  { %v1632_v30 = vpack.c.bf16 %v1394_v28, %v1393_v26  ;;  %v1633_v31 = vpack.c.bf16 %v1396_v29, %v1395_v27 }
 0x149   :  { %1624 = vst [vmem:[%s2166_s3 + $0x30] sm:$0x77] %v1632_v30  ;;  %1625 = vst [vmem:[%s2166_s3 + $0x38] sm:$0x77] %v1633_v31 }

</bundles_post_ra>
